<compile_context>
chip_gen: v7x
topology: tpu7x:2x2x1
jax: 0.10.0
libtpu: 0.0.40
codegen_flags: <defaults>
</compile_context>

<pallas_src>
import jax
import jax.numpy as jnp
from jax import lax
from jax.experimental import pallas as pl
from jax.experimental.pallas import tpu as pltpu


def _round_up(x, m):
    return (x + m - 1) // m * m


def _critic_kernel(s_ref, a_ref,
                   w1s_ref, w1a_ref, b1_ref,
                   w2_ref, b2_ref,
                   w3_ref, b3_ref,
                   q_ref):
    # Compute dtype comes from the (pre-cast) weights; .astype is a no-op for f32.
    cdt = w1s_ref.dtype
    # Contract lhs dim 1 with rhs dim 1:  [out, in] x [tb, in] -> [out, tb].
    dn = (((1,), (1,)), ((), ()))

    s = s_ref[...].astype(cdt)          # in-kernel cast (VPU), no HBM copy
    a = a_ref[...].astype(cdt)

    # l1: h = relu(W1s @ s^T + W1a @ a^T + b1)   -> [h1, tb] (lane-dense)
    h = lax.dot_general(w1s_ref[...], s, dn, preferred_element_type=jnp.float32)
    h = h + lax.dot_general(w1a_ref[...], a, dn, preferred_element_type=jnp.float32)
    h = jnp.maximum(h + b1_ref[...], 0.0)

    # l2: [h2, tb]
    h = jnp.dot(w2_ref[...], h.astype(cdt), preferred_element_type=jnp.float32)
    h = jnp.maximum(h + b2_ref[...], 0.0)

    # l3 (no activation): [1, tb]  -- lane-dense output block
    q = jnp.dot(w3_ref[...], h.astype(cdt), preferred_element_type=jnp.float32)
    q_ref[...] = (q + b3_ref[...]).astype(q_ref.dtype)


def prepare_critic_params(params, state_dim, *, compute_dtype=None):
    """One-time param prep (hoisted out of the forward pass).

    Splits l1's weight along its input axis (so no concat is ever needed),
    keeps native [out, in] layout (no transposes), reshapes biases to [out, 1]
    f32 columns, and optionally pre-casts weights to `compute_dtype` (bf16 on
    v5e/v6e/v7x halves weight HBM bytes; accumulation stays f32 in-kernel).
    """
    w1, b1, w2, b2, w3, b3 = (params["w1"], params["b1"], params["w2"],
                              params["b2"], params["w3"], params["b3"])
    wdt = jnp.float32 if compute_dtype is None else compute_dtype
    w1s = w1[:, :state_dim].astype(wdt)
    w1a = w1[:, state_dim:].astype(wdt)
    return (w1s, w1a, b1.reshape(-1, 1).astype(jnp.float32),
            w2.astype(wdt), b2.reshape(-1, 1).astype(jnp.float32),
            w3.astype(wdt), b3.reshape(-1, 1).astype(jnp.float32))


def critic_forward(state, action, prepared_params, *, batch_tile=2048):
    """state: [B, state_dim], action: [B, action_dim] -> q: [B, 1] (float32)."""
    weights = tuple(prepared_params)
    B, state_dim = state.shape
    action_dim = action.shape[1]
    out_shape = jax.ShapeDtypeStruct((1, B), jnp.float32)

    # ------- small batch: no grid, whole arrays VMEM-resident (no pipeline) ---
    if B <= batch_tile:
        q = pl.pallas_call(_critic_kernel, out_shape=out_shape)(
            state, action, *weights)
        return q.reshape(B, 1)

    # ------- large batch: stream batch tiles, weights DMA'd once --------------
    n_target = pl.cdiv(B, batch_tile)
    if n_target % 2:                      # v7x megacore: prefer an even tile count
        n_target += 1
    tile = _round_up(pl.cdiv(B, n_target), 128)   # lane-dense output blocks
    n_tiles = pl.cdiv(B, tile)            # partial last block handled by Pallas

    def act_spec(feat_dim):
        return pl.BlockSpec((tile, feat_dim), lambda i: (i, 0))

    def resident_spec(x):
        # Full-array block, same block every step -> DMA'd once, VMEM-resident.
        return pl.BlockSpec(x.shape, lambda i: (0, 0))

    q = pl.pallas_call(
        _critic_kernel,
        out_shape=out_shape,
        grid=(n_tiles,),
        in_specs=[act_spec(state_dim), act_spec(action_dim)]
                 + [resident_spec(x) for x in weights],
        out_specs=pl.BlockSpec((1, tile), lambda i: (0, i)),
        compiler_params=pltpu.CompilerParams(
            dimension_semantics=("parallel",)),   # shard tiles across v7x's 2 TCs
    )(state, action, *weights)
    return q.reshape(B, 1)


def init_critic_params(key, state_dim, action_dim, hidden_sizes=(256, 256)):
    """Deterministic synthetic init (uniform fan-in, PyTorch Linear layout)."""
    h1, h2 = hidden_sizes
    k = jax.random.split(key, 6)

    def lin_init(kw, kb, fan_in, fan_out):
        bound = 1.0 / jnp.sqrt(fan_in)
        w = jax.random.uniform(kw, (fan_out, fan_in), jnp.float32, -bound, bound)
        b = jax.random.uniform(kb, (fan_out,), jnp.float32, -bound, bound)
        return w, b

    w1, b1 = lin_init(k[0], k[1], state_dim + action_dim, h1)
    w2, b2 = lin_init(k[2], k[3], h1, h2)
    w3, b3 = lin_init(k[4], k[5], h2, 1)
    return {"w1": w1, "b1": b1, "w2": w2, "b2": b2, "w3": w3, "b3": b3}


def critic_reference(state, action, p):
    sa = jnp.concatenate([state, action], axis=1)
    q = jax.nn.relu(sa @ p["w1"].T + p["b1"])
    q = jax.nn.relu(q @ p["w2"].T + p["b2"])
    return q @ p["w3"].T + p["b3"]


if __name__ == "__main__":
    key = jax.random.PRNGKey(0)
    k_param, k_state, k_action = jax.random.split(key, 3)

    state_dim, action_dim = 24, 8
    hidden_sizes = (256, 256)             # module default
    params = init_critic_params(k_param, state_dim, action_dim, hidden_sizes)

    # One-time param prep (split / reshape / optional cast) -- outside forward.
    prep_f32 = prepare_critic_params(params, state_dim)
    prep_bf16 = prepare_critic_params(params, state_dim,
                                      compute_dtype=jnp.bfloat16)

    # ---- 1) small batch, f32, no-grid path ----
    B = 8
    state = jax.random.normal(k_state, (B, state_dim), jnp.float32)
    action = jax.random.normal(k_action, (B, action_dim), jnp.float32)
    q = jax.block_until_ready(critic_forward(state, action, prep_f32))
    q_ref = critic_reference(state, action, params)
    assert q.shape == (B, 1)
    assert jnp.allclose(q, q_ref, atol=1e-4, rtol=1e-4), (q, q_ref)

    # ---- 2) bigger batch, small batch_tile -> grid path with partial tail ----
    B2 = 300
    state2 = jax.random.normal(k_state, (B2, state_dim), jnp.float32)
    action2 = jax.random.normal(k_action, (B2, action_dim), jnp.float32)
    q2 = jax.block_until_ready(
        critic_forward(state2, action2, prep_f32, batch_tile=128))
    q2_ref = critic_reference(state2, action2, params)
    assert q2.shape == (B2, 1)
    assert jnp.allclose(q2, q2_ref, atol=1e-4, rtol=1e-4), (q2, q2_ref)

    # ---- 3) bf16 operands / f32 accumulate (MXU-native), loose tolerance ----
    q3 = jax.block_until_ready(critic_forward(state, action, prep_bf16))
    assert q3.shape == (B, 1)
    assert jnp.allclose(q3, q_ref, atol=5e-2, rtol=5e-2), (q3, q_ref)

    print("KERNEL_OK")
</pallas_src>

<mosaic_0001>
module attributes {stable_mosaic.version = 11 : i64} {
  func.func @_critic_kernel(%arg0: memref<8x24xf32, #tpu.memory_space<vmem>>, %arg1: memref<8x8xf32, #tpu.memory_space<vmem>>, %arg2: memref<256x24xf32, #tpu.memory_space<vmem>>, %arg3: memref<256x8xf32, #tpu.memory_space<vmem>>, %arg4: memref<256x1xf32, #tpu.memory_space<vmem>>, %arg5: memref<256x256xf32, #tpu.memory_space<vmem>>, %arg6: memref<256x1xf32, #tpu.memory_space<vmem>>, %arg7: memref<1x256xf32, #tpu.memory_space<vmem>>, %arg8: memref<1x1xf32, #tpu.memory_space<vmem>>, %arg9: memref<1x8xf32, #tpu.memory_space<vmem>>) attributes {dimension_semantics = [], scalar_prefetch = 0 : i64, scratch_operands = 0 : i64, tpu.core_type = #tpu.core_type<tc>} {
    %c0 = arith.constant 0 : index
    %c0_0 = arith.constant 0 : index
    %0 = vector.load %arg0[%c0, %c0_0] : memref<8x24xf32, #tpu.memory_space<vmem>>, vector<8x24xf32>
    %c0_1 = arith.constant 0 : index
    %c0_2 = arith.constant 0 : index
    %1 = vector.load %arg1[%c0_1, %c0_2] : memref<8x8xf32, #tpu.memory_space<vmem>>, vector<8x8xf32>
    %c0_3 = arith.constant 0 : index
    %c0_4 = arith.constant 0 : index
    %2 = vector.load %arg2[%c0_3, %c0_4] : memref<256x24xf32, #tpu.memory_space<vmem>>, vector<256x24xf32>
    %cst = arith.constant dense<0.000000e+00> : vector<256x8xf32>
    %3 = tpu.matmul %2, %0, %cst {dimension_numbers = #tpu.dot_dimension_numbers<[1], [1], [0], [0], [0, 0, 1, 0], [], []>} : vector<256x24xf32>, vector<8x24xf32>, vector<256x8xf32> -> vector<256x8xf32>
    %c0_5 = arith.constant 0 : index
    %c0_6 = arith.constant 0 : index
    %4 = vector.load %arg3[%c0_5, %c0_6] : memref<256x8xf32, #tpu.memory_space<vmem>>, vector<256x8xf32>
    %cst_7 = arith.constant dense<0.000000e+00> : vector<256x8xf32>
    %5 = tpu.matmul %4, %1, %cst_7 {dimension_numbers = #tpu.dot_dimension_numbers<[1], [1], [0], [0], [0, 0, 1, 0], [], []>} : vector<256x8xf32>, vector<8x8xf32>, vector<256x8xf32> -> vector<256x8xf32>
    %6 = arith.addf %3, %5 : vector<256x8xf32>
    %c0_8 = arith.constant 0 : index
    %c0_9 = arith.constant 0 : index
    %7 = vector.load %arg4[%c0_8, %c0_9] : memref<256x1xf32, #tpu.memory_space<vmem>>, vector<256x1xf32>
    %8 = vector.broadcast %7 : vector<256x1xf32> to vector<256x8xf32>
    %9 = arith.addf %6, %8 : vector<256x8xf32>
    %cst_10 = arith.constant 0.000000e+00 : f32
    %10 = vector.broadcast %cst_10 : f32 to vector<256x8xf32>
    %11 = arith.maximumf %9, %10 : vector<256x8xf32>
    %c0_11 = arith.constant 0 : index
    %c0_12 = arith.constant 0 : index
    %12 = vector.load %arg5[%c0_11, %c0_12] : memref<256x256xf32, #tpu.memory_space<vmem>>, vector<256x256xf32>
    %cst_13 = arith.constant dense<0.000000e+00> : vector<256x8xf32>
    %13 = tpu.matmul %12, %11, %cst_13 {dimension_numbers = #tpu.dot_dimension_numbers<[1], [0], [0], [1], [0, 0, 1, 1], [], []>} : vector<256x256xf32>, vector<256x8xf32>, vector<256x8xf32> -> vector<256x8xf32>
    %c0_14 = arith.constant 0 : index
    %c0_15 = arith.constant 0 : index
    %14 = vector.load %arg6[%c0_14, %c0_15] : memref<256x1xf32, #tpu.memory_space<vmem>>, vector<256x1xf32>
    %15 = vector.broadcast %14 : vector<256x1xf32> to vector<256x8xf32>
    %16 = arith.addf %13, %15 : vector<256x8xf32>
    %cst_16 = arith.constant 0.000000e+00 : f32
    %17 = vector.broadcast %cst_16 : f32 to vector<256x8xf32>
    %18 = arith.maximumf %16, %17 : vector<256x8xf32>
    %c0_17 = arith.constant 0 : index
    %c0_18 = arith.constant 0 : index
    %19 = vector.load %arg7[%c0_17, %c0_18] : memref<1x256xf32, #tpu.memory_space<vmem>>, vector<1x256xf32>
    %cst_19 = arith.constant dense<0.000000e+00> : vector<1x8xf32>
    %20 = tpu.matmul %19, %18, %cst_19 {dimension_numbers = #tpu.dot_dimension_numbers<[1], [0], [0], [1], [0, 0, 1, 1], [], []>} : vector<1x256xf32>, vector<256x8xf32>, vector<1x8xf32> -> vector<1x8xf32>
    %c0_20 = arith.constant 0 : index
    %c0_21 = arith.constant 0 : index
    %21 = vector.load %arg8[%c0_20, %c0_21] : memref<1x1xf32, #tpu.memory_space<vmem>>, vector<1x1xf32>
    %22 = vector.broadcast %21 : vector<1x1xf32> to vector<1x8xf32>
    %23 = arith.addf %20, %22 : vector<1x8xf32>
    %c0_22 = arith.constant 0 : index
    %c0_23 = arith.constant 0 : index
    %24 = vector.load %arg9[%c0_22, %c0_23] : memref<1x8xf32, #tpu.memory_space<vmem>>, vector<1x8xf32>
    tpu.vector_store %arg9[%c0_22, %c0_23], %23 {strides = array<i32>} : memref<1x8xf32, #tpu.memory_space<vmem>>, vector<1x8xf32>,
    return
  }
}

</mosaic_0001>

<bundles_post_ra>
// kernel: tpu_custom_call.1
= control target key start
LH: loop header
LB: loop body
LE: loop exit
PB: predicated region body
PF: predicated region fallthrough
CT: control target
= control target key end

     0   :  { %s2853_s0 = inlined_call_operand.vmem [shape: f32[8,24], index: 0, kind: input, shape index: {}]   ;;  %s2854_s1 = inlined_call_operand.vmem [shape: f32[8,8], index: 1, kind: input, shape index: {}]   ;;  %s2855_s2 = inlined_call_operand.vmem [shape: f32[256,24], index: 2, kind: input, shape index: {}]   ;;  %s2856_s3 = inlined_call_operand.vmem [shape: f32[256,8], index: 3, kind: input, shape index: {}]   ;;  %s2857_s4 = inlined_call_operand.vmem [shape: f32[256,1], index: 4, kind: input, shape index: {}]   ;;  %s2858_s5 = inlined_call_operand.vmem [shape: f32[256,256], index: 5, kind: input, shape index: {}]   ;;  %s2859_s6 = inlined_call_operand.vmem [shape: f32[256,1], index: 6, kind: input, shape index: {}]   ;;  %s2860_s7 = inlined_call_operand.vmem [shape: f32[1,256], index: 7, kind: input, shape index: {}]   ;;  %s2861_s8 = inlined_call_operand.<no memory space> [shape: f32[1,1], index: 8, kind: input, shape index: {}]   ;;  %s2862_s9 = inlined_call_operand.hbm [shape: f32[1,8], index: 9, kind: output, shape index: {}]  }
   0x1   :  { %v14_v0 = vstv %s2861_s8 }
   0x2   :  { %15 = vst [vmem:[#allocation2] sm:$0x1] %v14_v0 }
   0x3   :  { %v36_v1 = vld [vmem:[%s2854_s1] sm:$0xff]  ;;  %vm101_vm0 = vcmask 64512   ;;  %vm426_vm1 = vcmask 195584   ;;  %v70_v4 = vld [vmem:[%s2856_s3 + $0x8] sm:$0xff]  ;;  %v2036_v5 = vmov 0   ;;  %v71_v6 = vld [vmem:[%s2856_s3 + $0x10] sm:$0xff] }
   0x4   :  { %v69_v2 = vld [vmem:[%s2856_s3] sm:$0xff]  ;;  %1795 = vmatprep.subr.msk.mxu0 %vm101_vm0, %v36_v1  ;;  %2010 = vset.pattern.permute.xlu0 %v2036_v5  ;;  %v72_v8 = vld [vmem:[%s2856_s3 + $0x18] sm:$0xff]  ;;  %v752_v9 = vld [vmem:[%s2857_s4 + $0x8] sm:$0xff] }
   0x5   :  { %1797 = vmatprep.mubr.msk.f32.mxu0 %vm101_vm0, %v69_v2  ;;  %v35_v3 = vld [vmem:[%s2853_s0] sm:$0xff]  ;;  %1796 = vmatpush3.xpose.msk.msra.mxu0 %vm101_vm0, %v36_v1  ;;  %v753_v10 = vld [vmem:[%s2857_s4 + $0x10] sm:$0xff]  ;;  %v754_v12 = vld [vmem:[%s2857_s4 + $0x18] sm:$0xff] }
   0x6   :  { %1845 = vmatprep.subr.msk.mxu0 %vm426_vm1, %v35_v3  ;;  %2011 = vset.pattern.permute.xlu1 %v2036_v5  ;;  %v751_v7 = vld [vmem:[%s2857_s4] sm:$0xff]  ;;  %v74_v13 = vld [vmem:[%s2856_s3 + $0x28] sm:$0xff]  ;;  %v75_v15 = vld [vmem:[%s2856_s3 + $0x30] sm:$0xff] }
   0x7   :  { %785 = vperm.xlu0 %2010, %v751_v7   ;;  %v73_v11 = vld [vmem:[%s2856_s3 + $0x20] sm:$0xff]  ;;  %795 = vperm.xlu1 %2011, %v753_v10   ;;  %v756_v16 = vld [vmem:[%s2857_s4 + $0x28] sm:$0xff]  ;;  %v76_v17 = vld [vmem:[%s2856_s3 + $0x38] sm:$0xff] }
   0x8   :  { %1798 = vmatmul.mubr.msk.f32.vlgmr.msra.gmra.mrb[0].mxu0 %vm101_vm0, %v70_v4  ;;  %v755_v14 = vld [vmem:[%s2857_s4 + $0x20] sm:$0xff]  ;;  %v757_v18 = vld [vmem:[%s2857_s4 + $0x30] sm:$0xff]  ;;  %v758_v20 = vld [vmem:[%s2857_s4 + $0x38] sm:$0xff] }
   0x9   :  { %1800 = vmatprep.mubr.msk.f32.mxu0 %vm101_vm0, %v71_v6  ;;  %1846 = vmatpush3.xpose.msk.msra.mxu0 %vm426_vm1, %v35_v3  ;;  %v77_v19 = vld [vmem:[%s2856_s3 + $0x40] sm:$0xff]  ;;  %v78_v21 = vld [vmem:[%s2856_s3 + $0x48] sm:$0xff]  ;;  %v79_v23 = vld [vmem:[%s2856_s3 + $0x50] sm:$0xff] }
   0xa   :  { %v759_v22 = vld [vmem:[%s2857_s4 + $0x40] sm:$0xff]  ;;  %v760_v24 = vld [vmem:[%s2857_s4 + $0x48] sm:$0xff]  ;;  %v80_v25 = vld [vmem:[%s2856_s3 + $0x58] sm:$0xff] }
   0xb   :  { %790 = vperm.xlu0 %2010, %v752_v9   ;;  %800 = vperm.xlu1 %2011, %v754_v12   ;;  %v761_v26 = vld [vmem:[%s2857_s4 + $0x50] sm:$0xff]  ;;  %v81_v27 = vld [vmem:[%s2856_s3 + $0x60] sm:$0xff]  ;;  %v762_v28 = vld [vmem:[%s2857_s4 + $0x58] sm:$0xff] }
   0xc   :  { %1801 = vmatmul.mubr.msk.f32.gmra.mrb[2].mxu0 %vm101_vm0, %v72_v8  ;;  %v82_v29 = vld [vmem:[%s2856_s3 + $0x68] sm:$0xff]  ;;  %v763_v30 = vld [vmem:[%s2857_s4 + $0x60] sm:$0xff]  ;;  %v83_v31 = vld [vmem:[%s2856_s3 + $0x70] sm:$0xff] }
   0xd   :  { %1803 = vmatprep.mubr.msk.f32.mxu0 %vm101_vm0, %v73_v11  ;;  %v764_v32 = vld [vmem:[%s2857_s4 + $0x68] sm:$0xff]  ;;  %v84_v33 = vld [vmem:[%s2856_s3 + $0x78] sm:$0xff]  ;;  %v765_v34 = vld [vmem:[%s2857_s4 + $0x70] sm:$0xff] }
   0xe   :  { %v85_v35 = vld [vmem:[%s2856_s3 + $0x80] sm:$0xff]  ;;  %v766_v36 = vld [vmem:[%s2857_s4 + $0x78] sm:$0xff]  ;;  %v86_v37 = vld [vmem:[%s2856_s3 + $0x88] sm:$0xff] }
   0xf   :  { %805 = vperm.xlu0 %2010, %v755_v14   ;;  %810 = vperm.xlu1 %2011, %v756_v16   ;;  %v767_v38 = vld [vmem:[%s2857_s4 + $0x80] sm:$0xff]  ;;  %v87_v39 = vld [vmem:[%s2856_s3 + $0x90] sm:$0xff]  ;;  %v768_v40 = vld [vmem:[%s2857_s4 + $0x88] sm:$0xff] }
  0x10   :  { %1804 = vmatmul.mubr.msk.f32.gmra.mrb[4].mxu0 %vm101_vm0, %v74_v13  ;;  %v88_v41 = vld [vmem:[%s2856_s3 + $0x98] sm:$0xff]  ;;  %v769_v42 = vld [vmem:[%s2857_s4 + $0x90] sm:$0xff]  ;;  %v89_v43 = vld [vmem:[%s2856_s3 + $0xa0] sm:$0xff] }
  0x11   :  { %1806 = vmatprep.mubr.msk.f32.mxu0 %vm101_vm0, %v75_v15  ;;  %v770_v44 = vld [vmem:[%s2857_s4 + $0x98] sm:$0xff]  ;;  %v90_v45 = vld [vmem:[%s2856_s3 + $0xa8] sm:$0xff]  ;;  %v771_v46 = vld [vmem:[%s2857_s4 + $0xa0] sm:$0xff] }
  0x12   :  { %v91_v47 = vld [vmem:[%s2856_s3 + $0xb0] sm:$0xff] }
  0x13   :  { %815 = vperm.xlu0 %2010, %v757_v18   ;;  %820 = vperm.xlu1 %2011, %v758_v20  }
  0x14   :  { %1807 = vmatmul.mubr.msk.f32.gmra.mrb[6].mxu0 %vm101_vm0, %v76_v17 }
  0x15   :  { %1809 = vmatprep.mubr.msk.f32.mxu0 %vm101_vm0, %v77_v19 }
  0x17   :  { %825 = vperm.xlu0 %2010, %v759_v22   ;;  %830 = vperm.xlu1 %2011, %v760_v24  }
  0x18   :  { %1810 = vmatmul.mubr.msk.f32.gmra.mrb[8].mxu0 %vm101_vm0, %v78_v21 }
  0x19   :  { %1812 = vmatprep.mubr.msk.f32.mxu0 %vm101_vm0, %v79_v23 }
  0x1b   :  { %835 = vperm.xlu0 %2010, %v761_v26   ;;  %840 = vperm.xlu1 %2011, %v762_v28  }
  0x1c   :  { %1813 = vmatmul.mubr.msk.f32.gmra.mrb[10].mxu0 %vm101_vm0, %v80_v25 }
  0x1d   :  { %1815 = vmatprep.mubr.msk.f32.mxu0 %vm101_vm0, %v81_v27 }
  0x1f   :  { %845 = vperm.xlu0 %2010, %v763_v30   ;;  %850 = vperm.xlu1 %2011, %v764_v32  }
  0x20   :  { %1816 = vmatmul.mubr.msk.f32.gmra.mrb[12].mxu0 %vm101_vm0, %v82_v29 }
  0x21   :  { %1818 = vmatprep.mubr.msk.f32.mxu0 %vm101_vm0, %v83_v31 }
  0x23   :  { %855 = vperm.xlu0 %2010, %v765_v34   ;;  %860 = vperm.xlu1 %2011, %v766_v36  }
  0x24   :  { %1819 = vmatmul.mubr.msk.f32.gmra.mrb[14].mxu0 %vm101_vm0, %v84_v33 }
  0x25   :  { %1821 = vmatprep.mubr.msk.f32.mxu0 %vm101_vm0, %v85_v35 }
  0x27   :  { %865 = vperm.xlu0 %2010, %v767_v38   ;;  %870 = vperm.xlu1 %2011, %v768_v40  }
  0x28   :  { %1822 = vmatmul.mubr.msk.f32.gmra.mrb[16].mxu0 %vm101_vm0, %v86_v37 }
  0x29   :  { %1824 = vmatprep.mubr.msk.f32.mxu0 %vm101_vm0, %v87_v39 }
  0x2b   :  { %875 = vperm.xlu0 %2010, %v769_v42   ;;  %880 = vperm.xlu1 %2011, %v770_v44  }
  0x2c   :  { %1825 = vmatmul.mubr.msk.f32.gmra.mrb[18].mxu0 %vm101_vm0, %v88_v41 }
  0x2d   :  { %1827 = vmatprep.mubr.msk.f32.mxu0 %vm101_vm0, %v89_v43 }
  0x2e   :  { %16 = vsyncpa [#allocation4], 0  ;;  %v772_v48 = vld [vmem:[%s2857_s4 + $0xa8] sm:$0xff]  ;;  %v92_v49 = vld [vmem:[%s2856_s3 + $0xb8] sm:$0xff]  ;;  %vm1612_vm2 = vcmask 57344  }
  0x2f   :  { %885 = vperm.xlu0 %2010, %v771_v46   ;;  %v773_v50 = vld [vmem:[%s2857_s4 + $0xb0] sm:$0xff]  ;;  %v93_v51 = vld [vmem:[%s2856_s3 + $0xc0] sm:$0xff]  ;;  %890 = vperm.xlu1 %2011, %v772_v48   ;;  %v774_v52 = vld [vmem:[%s2857_s4 + $0xb8] sm:$0xff] }
  0x30   :  { %1828 = vmatmul.mubr.msk.f32.gmra.mrb[20].mxu0 %vm101_vm0, %v90_v45  ;;  %v94_v53 = vld [vmem:[%s2856_s3 + $0xc8] sm:$0xff]  ;;  %v775_v54 = vld [vmem:[%s2857_s4 + $0xc0] sm:$0xff]  ;;  %v95_v55 = vld [vmem:[%s2856_s3 + $0xd0] sm:$0xff] }
  0x31   :  { %1830 = vmatprep.mubr.msk.f32.mxu0 %vm101_vm0, %v91_v47  ;;  %v776_v56 = vld [vmem:[%s2857_s4 + $0xc8] sm:$0xff]  ;;  %v96_v57 = vld [vmem:[%s2856_s3 + $0xd8] sm:$0xff]  ;;  %v777_v58 = vld [vmem:[%s2857_s4 + $0xd0] sm:$0xff] }
  0x32   :  { %v97_v59 = vld [vmem:[%s2856_s3 + $0xe0] sm:$0xff]  ;;  %v778_v60 = vld [vmem:[%s2857_s4 + $0xd8] sm:$0xff]  ;;  %v98_v61 = vld [vmem:[%s2856_s3 + $0xe8] sm:$0xff] }
  0x33   :  { %895 = vperm.xlu0 %2010, %v773_v50   ;;  %900 = vperm.xlu1 %2011, %v774_v52   ;;  %v779_v62 = vld [vmem:[%s2857_s4 + $0xe0] sm:$0xff]  ;;  %v99_v63 = vld [vmem:[%s2856_s3 + $0xf0] sm:$0xff]  ;;  %v780_v0 = vld [vmem:[%s2857_s4 + $0xe8] sm:$0xff] }
  0x34   :  { %1831 = vmatmul.mubr.msk.f32.gmra.mrb[22].mxu0 %vm101_vm0, %v92_v49  ;;  %v100_v1 = vld [vmem:[%s2856_s3 + $0xf8] sm:$0xff]  ;;  %v781_v2 = vld [vmem:[%s2857_s4 + $0xf0] sm:$0xff]  ;;  %v37_v3 = vld [vmem:[%s2855_s2] sm:$0xff] }
  0x35   :  { %1833 = vmatprep.mubr.msk.f32.mxu0 %vm101_vm0, %v93_v51  ;;  %v782_v4 = vld [vmem:[%s2857_s4 + $0xf8] sm:$0xff]  ;;  %v38_v5 = vld [vmem:[%s2855_s2 + $0x8] sm:$0xff]  ;;  %v1087_v6 = vld [vmem:[%s2859_s6 + $0x80] sm:$0xff] }
  0x36   :  { %v39_v7 = vld [vmem:[%s2855_s2 + $0x10] sm:$0xff]  ;;  %v1088_v8 = vld [vmem:[%s2859_s6 + $0x88] sm:$0xff]  ;;  %v40_v9 = vld [vmem:[%s2855_s2 + $0x18] sm:$0xff] }
  0x37   :  { %905 = vperm.xlu0 %2010, %v775_v54   ;;  %910 = vperm.xlu1 %2011, %v776_v56   ;;  %v1071_v10 = vld [vmem:[%s2859_s6] sm:$0xff]  ;;  %v1072_v12 = vld [vmem:[%s2859_s6 + $0x8] sm:$0xff]  ;;  %v1089_v14 = vld [vmem:[%s2859_s6 + $0x90] sm:$0xff] }
  0x38   :  { %1834 = vmatmul.mubr.msk.f32.gmra.mrb[24].mxu0 %vm101_vm0, %v94_v53  ;;  %v41_v11 = vld [vmem:[%s2855_s2 + $0x20] sm:$0xff]  ;;  %v42_v13 = vld [vmem:[%s2855_s2 + $0x28] sm:$0xff]  ;;  %v43_v15 = vld [vmem:[%s2855_s2 + $0x30] sm:$0xff] }
  0x39   :  { %1836 = vmatprep.mubr.msk.f32.mxu0 %vm101_vm0, %v95_v55  ;;  %v1090_v16 = vld [vmem:[%s2859_s6 + $0x98] sm:$0xff]  ;;  %v1073_v18 = vld [vmem:[%s2859_s6 + $0x10] sm:$0xff]  ;;  %v45_v19 = vld [vmem:[%s2855_s2 + $0x40] sm:$0xff] }
  0x3a   :  { %v44_v17 = vld [vmem:[%s2855_s2 + $0x38] sm:$0xff]  ;;  %v46_v21 = vld [vmem:[%s2855_s2 + $0x48] sm:$0xff]  ;;  %v1091_v22 = vld [vmem:[%s2859_s6 + $0xa0] sm:$0xff] }
  0x3b   :  { %915 = vperm.xlu0 %2010, %v777_v58   ;;  %920 = vperm.xlu1 %2011, %v778_v60   ;;  %v1074_v20 = vld [vmem:[%s2859_s6 + $0x18] sm:$0xff]  ;;  %v47_v23 = vld [vmem:[%s2855_s2 + $0x50] sm:$0xff]  ;;  %v1092_v24 = vld [vmem:[%s2859_s6 + $0xa8] sm:$0xff] }
  0x3c   :  { %1837 = vmatmul.mubr.msk.f32.gmra.mrb[26].mxu0 %vm101_vm0, %v96_v57  ;;  %v48_v25 = vld [vmem:[%s2855_s2 + $0x58] sm:$0xff]  ;;  %v1075_v26 = vld [vmem:[%s2859_s6 + $0x20] sm:$0xff]  ;;  %v1076_v28 = vld [vmem:[%s2859_s6 + $0x28] sm:$0xff] }
  0x3d   :  { %1839 = vmatprep.mubr.msk.f32.mxu0 %vm101_vm0, %v97_v59  ;;  %v49_v27 = vld [vmem:[%s2855_s2 + $0x60] sm:$0xff]  ;;  %v50_v29 = vld [vmem:[%s2855_s2 + $0x68] sm:$0xff]  ;;  %v1093_v30 = vld [vmem:[%s2859_s6 + $0xb0] sm:$0xff] }
  0x3e   :  { %v51_v31 = vld [vmem:[%s2855_s2 + $0x70] sm:$0xff]  ;;  %v1094_v32 = vld [vmem:[%s2859_s6 + $0xb8] sm:$0xff]  ;;  %v53_v35 = vld [vmem:[%s2855_s2 + $0x80] sm:$0xff] }
  0x3f   :  { %925 = vperm.xlu0 %2010, %v779_v62   ;;  %930 = vperm.xlu1 %2011, %v780_v0   ;;  %v52_v33 = vld [vmem:[%s2855_s2 + $0x78] sm:$0xff]  ;;  %v1077_v34 = vld [vmem:[%s2859_s6 + $0x30] sm:$0xff]  ;;  %v54_v37 = vld [vmem:[%s2855_s2 + $0x88] sm:$0xff] }
  0x40   :  { %1840 = vmatmul.mubr.msk.f32.gmra.mrb[28].mxu0 %vm101_vm0, %v98_v61  ;;  %v1078_v36 = vld [vmem:[%s2859_s6 + $0x38] sm:$0xff]  ;;  %v1095_v38 = vld [vmem:[%s2859_s6 + $0xc0] sm:$0xff]  ;;  %v55_v39 = vld [vmem:[%s2855_s2 + $0x90] sm:$0xff] }
  0x41   :  { %1842 = vmatprep.mubr.msk.f32.mxu0 %vm101_vm0, %v99_v63  ;;  %v1096_v40 = vld [vmem:[%s2859_s6 + $0xc8] sm:$0xff]  ;;  %v56_v41 = vld [vmem:[%s2855_s2 + $0x98] sm:$0xff]  ;;  %v1079_v42 = vld [vmem:[%s2859_s6 + $0x40] sm:$0xff] }
  0x42   :  { %v57_v43 = vld [vmem:[%s2855_s2 + $0xa0] sm:$0xff]  ;;  %v1080_v44 = vld [vmem:[%s2859_s6 + $0x48] sm:$0xff]  ;;  %v1097_v46 = vld [vmem:[%s2859_s6 + $0xd0] sm:$0xff] }
  0x43   :  { %935 = vperm.xlu0 %2010, %v781_v2   ;;  %940 = vperm.xlu1 %2011, %v782_v4   ;;  %v58_v45 = vld [vmem:[%s2855_s2 + $0xa8] sm:$0xff]  ;;  %v59_v47 = vld [vmem:[%s2855_s2 + $0xb0] sm:$0xff]  ;;  %v1098_v48 = vld [vmem:[%s2859_s6 + $0xd8] sm:$0xff] }
  0x44   :  { %1843 = vmatmul.mubr.msk.f32.gmra.mrb[30].mxu0 %vm101_vm0, %v100_v1  ;;  %v60_v49 = vld [vmem:[%s2855_s2 + $0xb8] sm:$0xff]  ;;  %v1081_v50 = vld [vmem:[%s2859_s6 + $0x50] sm:$0xff]  ;;  %v61_v51 = vld [vmem:[%s2855_s2 + $0xc0] sm:$0xff] }
  0x45   :  { %1847 = vmatprep.mubr.msk.f32.mxu0 %vm426_vm1, %v37_v3  ;;  %v1082_v52 = vld [vmem:[%s2859_s6 + $0x58] sm:$0xff]  ;;  %v62_v53 = vld [vmem:[%s2855_s2 + $0xc8] sm:$0xff]  ;;  %v1099_v54 = vld [vmem:[%s2859_s6 + $0xe0] sm:$0xff] }
  0x46   :  { %v63_v55 = vld [vmem:[%s2855_s2 + $0xd0] sm:$0xff]  ;;  %v1100_v56 = vld [vmem:[%s2859_s6 + $0xe8] sm:$0xff]  ;;  %v64_v57 = vld [vmem:[%s2855_s2 + $0xd8] sm:$0xff] }
  0x47   :  { %1185 = vperm.xlu0 %2010, %v1087_v6   ;;  %1190 = vperm.xlu1 %2011, %v1088_v8   ;;  %v1083_v58 = vld [vmem:[%s2859_s6 + $0x60] sm:$0xff]  ;;  %v1084_v60 = vld [vmem:[%s2859_s6 + $0x68] sm:$0xff]  ;;  %v1101_v62 = vld [vmem:[%s2859_s6 + $0xf0] sm:$0xff] }
  0x48   :  { %1848 = vmatmul.mubr.msk.f32.vlgmr.msra.gmra.mrb[0].mxu0 %vm426_vm1, %v38_v5  ;;  %v65_v59 = vld [vmem:[%s2855_s2 + $0xe0] sm:$0xff]  ;;  %v66_v61 = vld [vmem:[%s2855_s2 + $0xe8] sm:$0xff]  ;;  %v67_v63 = vld [vmem:[%s2855_s2 + $0xf0] sm:$0xff]  ;;  %v2037_v5 = vmov 0.0|0.0  }
  0x49   :  { %1850 = vmatprep.mubr.msk.f32.mxu0 %vm426_vm1, %v39_v7  ;;  %v1102_v0 = vld [vmem:[%s2859_s6 + $0xf8] sm:$0xff]  ;;  %v1085_v2 = vld [vmem:[%s2859_s6 + $0x70] sm:$0xff]  ;;  %v1521_v4 = vld [vmem:[#allocation2] sm:$0x1]  ;;  %1895 = vmatprep.subr.bf16.mxu1 %v2037_v5 }
  0x4a   :  { %v68_v1 = vld [vmem:[%s2855_s2 + $0xf8] sm:$0xff]  ;;  %v1008_v6 = vld [vmem:[%s2858_s5 + $0x8] sm:$0xff] }
  0x4b   :  { %1105 = vperm.xlu0 %2010, %v1071_v10   ;;  %1110 = vperm.xlu1 %2011, %v1072_v12   ;;  %v1086_v3 = vld [vmem:[%s2859_s6 + $0x78] sm:$0xff] }
  0x4c   :  { %1851 = vmatmul.mubr.msk.f32.gmra.mrb[2].mxu0 %vm426_vm1, %v40_v9  ;;  %1327 = vmatprep.mubr.f32.mxu1 %v1008_v6 }
  0x4d   :  { %1853 = vmatprep.mubr.msk.f32.mxu0 %vm426_vm1, %v41_v11 }
  0x4f   :  { %1195 = vperm.xlu0 %2010, %v1089_v14   ;;  %1200 = vperm.xlu1 %2011, %v1090_v16  }
  0x50   :  { %1854 = vmatmul.mubr.msk.f32.gmra.mrb[4].mxu0 %vm426_vm1, %v42_v13 }
  0x51   :  { %1856 = vmatprep.mubr.msk.f32.mxu0 %vm426_vm1, %v43_v15 }
  0x53   :  { %1115 = vperm.xlu0 %2010, %v1073_v18   ;;  %1120 = vperm.xlu1 %2011, %v1074_v20  }
  0x54   :  { %1857 = vmatmul.mubr.msk.f32.gmra.mrb[6].mxu0 %vm426_vm1, %v44_v17 }
  0x55   :  { %1859 = vmatprep.mubr.msk.f32.mxu0 %vm426_vm1, %v45_v19 }
  0x57   :  { %1205 = vperm.xlu0 %2010, %v1091_v22   ;;  %1210 = vperm.xlu1 %2011, %v1092_v24  }
  0x58   :  { %1860 = vmatmul.mubr.msk.f32.gmra.mrb[8].mxu0 %vm426_vm1, %v46_v21 }
  0x59   :  { %1862 = vmatprep.mubr.msk.f32.mxu0 %vm426_vm1, %v47_v23 }
  0x5b   :  { %1125 = vperm.xlu0 %2010, %v1075_v26   ;;  %1130 = vperm.xlu1 %2011, %v1076_v28  }
  0x5c   :  { %1863 = vmatmul.mubr.msk.f32.gmra.mrb[10].mxu0 %vm426_vm1, %v48_v25 }
  0x5d   :  { %1865 = vmatprep.mubr.msk.f32.mxu0 %vm426_vm1, %v49_v27 }
  0x5f   :  { %1215 = vperm.xlu0 %2010, %v1093_v30   ;;  %1220 = vperm.xlu1 %2011, %v1094_v32  }
  0x60   :  { %1866 = vmatmul.mubr.msk.f32.gmra.mrb[12].mxu0 %vm426_vm1, %v50_v29 }
  0x61   :  { %1868 = vmatprep.mubr.msk.f32.mxu0 %vm426_vm1, %v51_v31 }
  0x63   :  { %1135 = vperm.xlu0 %2010, %v1077_v34   ;;  %1140 = vperm.xlu1 %2011, %v1078_v36  }
  0x64   :  { %1869 = vmatmul.mubr.msk.f32.gmra.mrb[14].mxu0 %vm426_vm1, %v52_v33 }
  0x65   :  { %1871 = vmatprep.mubr.msk.f32.mxu0 %vm426_vm1, %v53_v35 }
  0x67   :  { %1225 = vperm.xlu0 %2010, %v1095_v38   ;;  %1230 = vperm.xlu1 %2011, %v1096_v40  }
  0x68   :  { %1872 = vmatmul.mubr.msk.f32.gmra.mrb[16].mxu0 %vm426_vm1, %v54_v37 }
  0x69   :  { %1874 = vmatprep.mubr.msk.f32.mxu0 %vm426_vm1, %v55_v39 }
  0x6b   :  { %1145 = vperm.xlu0 %2010, %v1079_v42   ;;  %1150 = vperm.xlu1 %2011, %v1080_v44  }
  0x6c   :  { %1875 = vmatmul.mubr.msk.f32.gmra.mrb[18].mxu0 %vm426_vm1, %v56_v41 }
  0x6d   :  { %1877 = vmatprep.mubr.msk.f32.mxu0 %vm426_vm1, %v57_v43 }
  0x6f   :  { %1235 = vperm.xlu0 %2010, %v1097_v46   ;;  %1240 = vperm.xlu1 %2011, %v1098_v48  }
  0x70   :  { %1878 = vmatmul.mubr.msk.f32.gmra.mrb[20].mxu0 %vm426_vm1, %v58_v45 }
  0x71   :  { %1880 = vmatprep.mubr.msk.f32.mxu0 %vm426_vm1, %v59_v47 }
  0x73   :  { %1155 = vperm.xlu0 %2010, %v1081_v50   ;;  %1160 = vperm.xlu1 %2011, %v1082_v52  }
  0x74   :  { %1881 = vmatmul.mubr.msk.f32.gmra.mrb[22].mxu0 %vm426_vm1, %v60_v49 }
  0x75   :  { %1883 = vmatprep.mubr.msk.f32.mxu0 %vm426_vm1, %v61_v51 }
  0x77   :  { %1245 = vperm.xlu0 %2010, %v1099_v54   ;;  %1250 = vperm.xlu1 %2011, %v1100_v56  }
  0x78   :  { %1884 = vmatmul.mubr.msk.f32.gmra.mrb[24].mxu0 %vm426_vm1, %v62_v53 }
  0x79   :  { %1886 = vmatprep.mubr.msk.f32.mxu0 %vm426_vm1, %v63_v55 }
  0x7b   :  { %1165 = vperm.xlu0 %2010, %v1083_v58   ;;  %1170 = vperm.xlu1 %2011, %v1084_v60  }
  0x7c   :  { %1887 = vmatmul.mubr.msk.f32.gmra.mrb[26].mxu0 %vm426_vm1, %v64_v57 }
  0x7d   :  { %1889 = vmatprep.mubr.msk.f32.mxu0 %vm426_vm1, %v65_v59 }
  0x7f   :  { %1255 = vperm.xlu0 %2010, %v1101_v62   ;;  %1260 = vperm.xlu1 %2011, %v1102_v0  }
  0x80   :  { %1890 = vmatmul.mubr.msk.f32.gmra.mrb[28].mxu0 %vm426_vm1, %v66_v61 }
  0x81   :  { %1892 = vmatprep.mubr.msk.f32.mxu0 %vm426_vm1, %v67_v63 }
  0x83   :  { %1175 = vperm.xlu0 %2010, %v1085_v2   ;;  %1180 = vperm.xlu1 %2011, %v1086_v3  }
  0x84   :  { %1893 = vmatmul.mubr.msk.f32.gmra.mrb[30].mxu0 %vm426_vm1, %v68_v1 }
  0x86   :  { %v796_v7 = vpop.permute.xlu1 %795  ;;  %v786_v8 = vpop.permute.xlu0 %785 }
  0x87   :  { %1524 = vperm.xlu0 %2010, %v1521_v4  }
  0x8a   :  { %v801_v9 = vpop.permute.xlu1 %800  ;;  %v791_v10 = vpop.permute.xlu0 %790 }
  0x8e   :  { %v811_v11 = vpop.permute.xlu1 %810  ;;  %v806_v12 = vpop.permute.xlu0 %805 }
  0x92   :  { %v821_v13 = vpop.permute.xlu1 %820  ;;  %v816_v14 = vpop.permute.xlu0 %815 }
  0x96   :  { %v831_v15 = vpop.permute.xlu1 %830  ;;  %v826_v16 = vpop.permute.xlu0 %825 }
  0x9a   :  { %v841_v17 = vpop.permute.xlu1 %840  ;;  %v836_v19 = vpop.permute.xlu0 %835 }
  0x9e   :  { %v851_v28 = vpop.permute.xlu1 %850  ;;  %v846_v31 = vpop.permute.xlu0 %845 }
  0xa2   :  { %v861_v40 = vpop.permute.xlu1 %860  ;;  %v856_v43 = vpop.permute.xlu0 %855 }
  0xa6   :  { %v871_v53 = vpop.permute.xlu1 %870  ;;  %v866_v56 = vpop.permute.xlu0 %865 }
  0xaa   :  { %v881_v1 = vpop.permute.xlu1 %880  ;;  %v876_v4 = vpop.permute.xlu0 %875 }
 0x11b   :  { %v1849_v18 = vpop.f32.mrb[0].mxu0 }
 0x11c   :  { %v944_v20 = vadd.f32 %v1849_v18, %v791_v10  ;;  %v592_v21 = vpop.f32.mrb[1].mxu0  ;;  %v886_v18 = vpop.permute.xlu0 %885 }
 0x11d   :  { %v943_v22 = vadd.f32 %v786_v8, %v592_v21 }
 0x11e   :  { %v976_v23 = vmax.f32 %v944_v20, 0.0 }
 0x11f   :  { %v975_v24 = vmax.f32 %v943_v22, 0.0  ;;  %v1852_v25 = vpop.f32.mrb[2].mxu0 }
 0x120   :  { %v946_v26 = vadd.f32 %v1852_v25, %v801_v9  ;;  %v602_v27 = vpop.f32.mrb[3].mxu0 }
 0x121   :  { %v945_v29 = vadd.f32 %v796_v7, %v602_v27  ;;  %v1896_v30 = vpack.c.bf16 %v976_v23, %v975_v24 }
 0x122   :  { %v978_v32 = vmax.f32 %v946_v26, 0.0 }
 0x123   :  { %v977_v33 = vmax.f32 %v945_v29, 0.0  ;;  %v1855_v34 = vpop.f32.mrb[4].mxu0  ;;  %1897 = vmatpush1.bf16.msra.mxu1 %v1896_v30  ;;  %v896_v30 = vpop.permute.xlu0 %895 }
 0x124   :  { %v948_v35 = vadd.f32 %v1855_v34, %v811_v11  ;;  %v612_v36 = vpop.f32.mrb[5].mxu0  ;;  %1898 = vmatprep.subr.bf16.mxu1 %v2037_v5 }
 0x125   :  { %v1899_v37 = vpack.c.bf16 %v978_v32, %v977_v33  ;;  %v947_v38 = vadd.f32 %v806_v12, %v612_v36 }
 0x126   :  { %v980_v39 = vmax.f32 %v948_v35, 0.0 }
 0x127   :  { %v979_v41 = vmax.f32 %v947_v38, 0.0  ;;  %v1858_v42 = vpop.f32.mrb[6].mxu0  ;;  %1900 = vmatpush1.bf16.msra.mxu1 %v1899_v37 }
 0x128   :  { %v950_v44 = vadd.f32 %v1858_v42, %v821_v13  ;;  %v622_v45 = vpop.f32.mrb[7].mxu0  ;;  %1901 = vmatprep.subr.bf16.mxu1 %v2037_v5 }
 0x129   :  { %v1902_v46 = vpack.c.bf16 %v980_v39, %v979_v41  ;;  %v949_v47 = vadd.f32 %v816_v14, %v622_v45 }
 0x12a   :  { %v982_v48 = vmax.f32 %v950_v44, 0.0 }
 0x12b   :  { %v981_v49 = vmax.f32 %v949_v47, 0.0  ;;  %v1861_v50 = vpop.f32.mrb[8].mxu0  ;;  %1903 = vmatpush1.bf16.msra.mxu1 %v1902_v46 }
 0x12c   :  { %v952_v51 = vadd.f32 %v1861_v50, %v831_v15  ;;  %v632_v52 = vpop.f32.mrb[9].mxu0  ;;  %1904 = vmatprep.subr.bf16.mxu1 %v2037_v5  ;;  %v891_v15 = vpop.permute.xlu1 %890 }
 0x12d   :  { %v1905_v54 = vpack.c.bf16 %v982_v48, %v981_v49  ;;  %v951_v55 = vadd.f32 %v826_v16, %v632_v52 }
 0x12e   :  { %v984_v57 = vmax.f32 %v952_v51, 0.0 }
 0x12f   :  { %v983_v58 = vmax.f32 %v951_v55, 0.0  ;;  %v1864_v59 = vpop.f32.mrb[10].mxu0  ;;  %1906 = vmatpush1.bf16.msra.mxu1 %v1905_v54 }
 0x130   :  { %v954_v60 = vadd.f32 %v1864_v59, %v841_v17  ;;  %v642_v61 = vpop.f32.mrb[11].mxu0  ;;  %1907 = vmatprep.subr.bf16.mxu1 %v2037_v5  ;;  %v901_v27 = vpop.permute.xlu1 %900 }
 0x131   :  { %v1908_v62 = vpack.c.bf16 %v984_v57, %v983_v58  ;;  %v953_v63 = vadd.f32 %v836_v19, %v642_v61 }
 0x132   :  { %v986_v0 = vmax.f32 %v954_v60, 0.0 }
 0x133   :  { %v985_v2 = vmax.f32 %v953_v63, 0.0  ;;  %v1867_v3 = vpop.f32.mrb[12].mxu0  ;;  %1909 = vmatpush1.bf16.msra.mxu1 %v1908_v62 }
 0x134   :  { %v956_v6 = vadd.f32 %v1867_v3, %v851_v28  ;;  %v652_v7 = vpop.f32.mrb[13].mxu0  ;;  %1910 = vmatprep.subr.bf16.mxu1 %v2037_v5 }
 0x135   :  { %v1911_v8 = vpack.c.bf16 %v986_v0, %v985_v2  ;;  %v955_v9 = vadd.f32 %v846_v31, %v652_v7 }
 0x136   :  { %v988_v10 = vmax.f32 %v956_v6, 0.0 }
 0x137   :  { %v987_v11 = vmax.f32 %v955_v9, 0.0  ;;  %v1870_v12 = vpop.f32.mrb[14].mxu0  ;;  %1912 = vmatpush1.bf16.msra.mxu1 %v1911_v8 }
 0x138   :  { %v958_v13 = vadd.f32 %v1870_v12, %v861_v40  ;;  %v662_v14 = vpop.f32.mrb[15].mxu0  ;;  %1913 = vmatprep.subr.bf16.mxu1 %v2037_v5  ;;  %v911_v40 = vpop.permute.xlu1 %910 }
 0x139   :  { %v1914_v16 = vpack.c.bf16 %v988_v10, %v987_v11  ;;  %v957_v17 = vadd.f32 %v856_v43, %v662_v14  ;;  %v906_v43 = vpop.permute.xlu0 %905 }
 0x13a   :  { %v990_v19 = vmax.f32 %v958_v13, 0.0 }
 0x13b   :  { %v989_v20 = vmax.f32 %v957_v17, 0.0  ;;  %v1873_v21 = vpop.f32.mrb[16].mxu0  ;;  %1915 = vmatpush1.bf16.msra.mxu1 %v1914_v16 }
 0x13c   :  { %v960_v22 = vadd.f32 %v1873_v21, %v871_v53  ;;  %v672_v23 = vpop.f32.mrb[17].mxu0  ;;  %1916 = vmatprep.subr.bf16.mxu1 %v2037_v5  ;;  %v921_v52 = vpop.permute.xlu1 %920 }
 0x13d   :  { %v1917_v24 = vpack.c.bf16 %v990_v19, %v989_v20  ;;  %v959_v25 = vadd.f32 %v866_v56, %v672_v23  ;;  %v916_v55 = vpop.permute.xlu0 %915 }
 0x13e   :  { %v992_v26 = vmax.f32 %v960_v22, 0.0 }
 0x13f   :  { %v991_v28 = vmax.f32 %v959_v25, 0.0  ;;  %v1876_v29 = vpop.f32.mrb[18].mxu0  ;;  %1918 = vmatpush1.bf16.msra.mxu1 %v1917_v24  ;;  %v1007_v25 = vld [vmem:[%s2858_s5] sm:$0xff] }
 0x140   :  { %v962_v31 = vadd.f32 %v1876_v29, %v881_v1  ;;  %v682_v32 = vpop.f32.mrb[19].mxu0  ;;  %1919 = vmatprep.subr.bf16.mxu1 %v2037_v5  ;;  %v931_v1 = vpop.permute.xlu1 %930  ;;  %v1014_v29 = vld [vmem:[%s2858_s5 + $0x38] sm:$0xff] }
 0x141   :  { %v1920_v33 = vpack.c.bf16 %v992_v26, %v991_v28  ;;  %v961_v34 = vadd.f32 %v876_v4, %v682_v32  ;;  %v926_v4 = vpop.permute.xlu0 %925  ;;  %v1010_v26 = vld [vmem:[%s2858_s5 + $0x18] sm:$0xff]  ;;  %v1011_v28 = vld [vmem:[%s2858_s5 + $0x20] sm:$0xff] }
 0x142   :  { %v994_v35 = vmax.f32 %v962_v31, 0.0  ;;  %v1016_v31 = vld [vmem:[%s2858_s5 + $0x48] sm:$0xff]  ;;  %v1015_v32 = vld [vmem:[%s2858_s5 + $0x40] sm:$0xff] }
 0x143   :  { %v993_v36 = vmax.f32 %v961_v34, 0.0  ;;  %v1879_v37 = vpop.f32.mrb[20].mxu0  ;;  %1921 = vmatpush1.bf16.msra.mxu1 %v1920_v33  ;;  %v1018_v33 = vld [vmem:[%s2858_s5 + $0x58] sm:$0xff]  ;;  %v1017_v34 = vld [vmem:[%s2858_s5 + $0x50] sm:$0xff] }
 0x144   :  { %v964_v38 = vadd.f32 %v1879_v37, %v891_v15  ;;  %v692_v39 = vpop.f32.mrb[21].mxu0  ;;  %1922 = vmatprep.subr.bf16.mxu1 %v2037_v5  ;;  %v941_v14 = vpop.permute.xlu1 %940  ;;  %v1022_v37 = vld [vmem:[%s2858_s5 + $0x78] sm:$0xff] }
 0x145   :  { %v1923_v41 = vpack.c.bf16 %v994_v35, %v993_v36  ;;  %v963_v42 = vadd.f32 %v886_v18, %v692_v39  ;;  %v936_v17 = vpop.permute.xlu0 %935  ;;  %v1020_v35 = vld [vmem:[%s2858_s5 + $0x68] sm:$0xff]  ;;  %v1019_v36 = vld [vmem:[%s2858_s5 + $0x60] sm:$0xff] }
 0x146   :  { %v996_v44 = vmax.f32 %v964_v38, 0.0  ;;  %v1021_v38 = vld [vmem:[%s2858_s5 + $0x70] sm:$0xff]  ;;  %v1024_v39 = vld [vmem:[%s2858_s5 + $0x88] sm:$0xff] }
 0x147   :  { %v995_v45 = vmax.f32 %v963_v42, 0.0  ;;  %v1882_v46 = vpop.f32.mrb[22].mxu0  ;;  %1924 = vmatpush1.bf16.msra.mxu1 %v1923_v41  ;;  %v1026_v41 = vld [vmem:[%s2858_s5 + $0x98] sm:$0xff]  ;;  %v1025_v42 = vld [vmem:[%s2858_s5 + $0x90] sm:$0xff] }
 0x148   :  { %v966_v47 = vadd.f32 %v1882_v46, %v901_v27  ;;  %v702_v48 = vpop.f32.mrb[23].mxu0  ;;  %1925 = vmatprep.subr.bf16.mxu1 %v2037_v5  ;;  %v1009_v27 = vld [vmem:[%s2858_s5 + $0x10] sm:$0xff] }
 0x149   :  { %v1926_v49 = vpack.c.bf16 %v996_v44, %v995_v45  ;;  %v965_v50 = vadd.f32 %v896_v30, %v702_v48  ;;  %v1013_v30 = vld [vmem:[%s2858_s5 + $0x30] sm:$0xff]  ;;  %v1027_v44 = vld [vmem:[%s2858_s5 + $0xa0] sm:$0xff]  ;;  %v1030_v45 = vld [vmem:[%s2858_s5 + $0xb8] sm:$0xff] }
 0x14a   :  { %v998_v51 = vmax.f32 %v966_v47, 0.0  ;;  %v1029_v46 = vld [vmem:[%s2858_s5 + $0xb0] sm:$0xff]  ;;  %v1032_v47 = vld [vmem:[%s2858_s5 + $0xc8] sm:$0xff]  ;;  %v1031_v48 = vld [vmem:[%s2858_s5 + $0xc0] sm:$0xff] }
 0x14b   :  { %v997_v53 = vmax.f32 %v965_v50, 0.0  ;;  %v1885_v54 = vpop.f32.mrb[24].mxu0  ;;  %1927 = vmatpush1.bf16.msra.mxu1 %v1926_v49  ;;  %v1034_v49 = vld [vmem:[%s2858_s5 + $0xd8] sm:$0xff]  ;;  %v1033_v50 = vld [vmem:[%s2858_s5 + $0xd0] sm:$0xff] }
 0x14c   :  { %v968_v56 = vadd.f32 %v1885_v54, %v911_v40  ;;  %v712_v57 = vpop.f32.mrb[25].mxu0  ;;  %1928 = vmatprep.subr.bf16.mxu1 %v2037_v5  ;;  %v1023_v40 = vld [vmem:[%s2858_s5 + $0x80] sm:$0xff]  ;;  %v1037_v54 = vld [vmem:[%s2858_s5 + $0xf0] sm:$0xff] }
 0x14d   :  { %v1929_v58 = vpack.c.bf16 %v998_v51, %v997_v53  ;;  %v967_v59 = vadd.f32 %v906_v43, %v712_v57  ;;  %v1028_v43 = vld [vmem:[%s2858_s5 + $0xa8] sm:$0xff]  ;;  %v1038_v53 = vld [vmem:[%s2858_s5 + $0xf8] sm:$0xff] }
 0x14e   :  { %v1000_v60 = vmax.f32 %v968_v56, 0.0  ;;  %v1036_v51 = vld [vmem:[%s2858_s5 + $0xe8] sm:$0xff]  ;;  %v1039_v56 = vld [vmem:[%s2858_s5 + $0x100] sm:$0xff]  ;;  %v1042_v57 = vld [vmem:[%s2858_s5 + $0x118] sm:$0xff] }
 0x14f   :  { %v999_v61 = vmax.f32 %v967_v59, 0.0  ;;  %v1888_v62 = vpop.f32.mrb[26].mxu0  ;;  %1930 = vmatpush1.bf16.msra.mxu1 %v1929_v58  ;;  %v1041_v58 = vld [vmem:[%s2858_s5 + $0x110] sm:$0xff]  ;;  %v1044_v59 = vld [vmem:[%s2858_s5 + $0x128] sm:$0xff] }
 0x150   :  { %v970_v63 = vadd.f32 %v1888_v62, %v921_v52  ;;  %v722_v0 = vpop.f32.mrb[27].mxu0  ;;  %1931 = vmatprep.subr.bf16.mxu1 %v2037_v5  ;;  %v1035_v52 = vld [vmem:[%s2858_s5 + $0xe0] sm:$0xff]  ;;  %v1045_v62 = vld [vmem:[%s2858_s5 + $0x130] sm:$0xff] }
 0x151   :  { %v1932_v2 = vpack.c.bf16 %v1000_v60, %v999_v61  ;;  %v969_v3 = vadd.f32 %v916_v55, %v722_v0  ;;  %v1040_v55 = vld [vmem:[%s2858_s5 + $0x108] sm:$0xff]  ;;  %v1043_v60 = vld [vmem:[%s2858_s5 + $0x120] sm:$0xff]  ;;  %v1046_v61 = vld [vmem:[%s2858_s5 + $0x138] sm:$0xff] }
 0x152   :  { %v1002_v6 = vmax.f32 %v970_v63, 0.0  ;;  %v1048_v63 = vld [vmem:[%s2858_s5 + $0x148] sm:$0xff]  ;;  %v1047_v0 = vld [vmem:[%s2858_s5 + $0x140] sm:$0xff] }
 0x153   :  { %v1001_v7 = vmax.f32 %v969_v3, 0.0  ;;  %v1891_v8 = vpop.f32.mrb[28].mxu0  ;;  %1933 = vmatpush1.bf16.msra.mxu1 %v1932_v2  ;;  %v1049_v2 = vld [vmem:[%s2858_s5 + $0x150] sm:$0xff]  ;;  %v1052_v3 = vld [vmem:[%s2858_s5 + $0x168] sm:$0xff] }
 0x154   :  { %v972_v9 = vadd.f32 %v1891_v8, %v931_v1  ;;  %v732_v10 = vpop.f32.mrb[29].mxu0  ;;  %1934 = vmatprep.subr.bf16.mxu1 %v2037_v5  ;;  %v1050_v1 = vld [vmem:[%s2858_s5 + $0x158] sm:$0xff]  ;;  %v1056_v8 = vld [vmem:[%s2858_s5 + $0x188] sm:$0xff] }
 0x155   :  { %v1935_v11 = vpack.c.bf16 %v1002_v6, %v1001_v7  ;;  %v971_v12 = vadd.f32 %v926_v4, %v732_v10  ;;  %v1051_v4 = vld [vmem:[%s2858_s5 + $0x160] sm:$0xff]  ;;  %v1054_v6 = vld [vmem:[%s2858_s5 + $0x178] sm:$0xff]  ;;  %v1053_v7 = vld [vmem:[%s2858_s5 + $0x170] sm:$0xff] }
 0x156   :  { %v1004_v13 = vmax.f32 %v972_v9, 0.0  ;;  %v1055_v9 = vld [vmem:[%s2858_s5 + $0x180] sm:$0xff]  ;;  %v1058_v10 = vld [vmem:[%s2858_s5 + $0x198] sm:$0xff] }
 0x157   :  { %v1003_v15 = vmax.f32 %v971_v12, 0.0  ;;  %v1894_v16 = vpop.f32.mrb[30].mxu0  ;;  %1936 = vmatpush1.bf16.msra.mxu1 %v1935_v11  ;;  %v1057_v11 = vld [vmem:[%s2858_s5 + $0x190] sm:$0xff]  ;;  %v1060_v12 = vld [vmem:[%s2858_s5 + $0x1a8] sm:$0xff] }
 0x158   :  { %v974_v18 = vadd.f32 %v1894_v16, %v941_v14  ;;  %v742_v19 = vpop.f32.mrb[31].mxu0  ;;  %1937 = vmatprep.subr.bf16.mxu1 %v2037_v5  ;;  %v1062_v14 = vld [vmem:[%s2858_s5 + $0x1b8] sm:$0xff]  ;;  %v1064_v16 = vld [vmem:[%s2858_s5 + $0x1c8] sm:$0xff] }
 0x159   :  { %v1938_v20 = vpack.c.bf16 %v1004_v13, %v1003_v15  ;;  %v973_v21 = vadd.f32 %v936_v17, %v742_v19  ;;  %v1059_v13 = vld [vmem:[%s2858_s5 + $0x1a0] sm:$0xff]  ;;  %v1061_v15 = vld [vmem:[%s2858_s5 + $0x1b0] sm:$0xff] }
 0x15a   :  { %v1006_v22 = vmax.f32 %v974_v18, 0.0  ;;  %v1063_v17 = vld [vmem:[%s2858_s5 + $0x1c0] sm:$0xff]  ;;  %v1066_v18 = vld [vmem:[%s2858_s5 + $0x1d8] sm:$0xff]  ;;  %v1065_v19 = vld [vmem:[%s2858_s5 + $0x1d0] sm:$0xff] }
 0x15b   :  { %v1005_v23 = vmax.f32 %v973_v21, 0.0  ;;  %1939 = vmatpush1.bf16.msra.mxu1 %v1938_v20  ;;  %v1068_v20 = vld [vmem:[%s2858_s5 + $0x1e8] sm:$0xff]  ;;  %v1067_v21 = vld [vmem:[%s2858_s5 + $0x1e0] sm:$0xff] }
 0x15c   :  { %1940 = vmatprep.subr.bf16.mxu1 %v2037_v5  ;;  %v1012_v5 = vld [vmem:[%s2858_s5 + $0x28] sm:$0xff] }
 0x15d   :  { %v1941_v24 = vpack.c.bf16 %v1006_v22, %v1005_v23  ;;  %v1070_v22 = vld [vmem:[%s2858_s5 + $0x1f8] sm:$0xff]  ;;  %v1069_v23 = vld [vmem:[%s2858_s5 + $0x1f0] sm:$0xff] }
 0x15f   :  { %1942 = vmatpush1.bf16.msra.mxu1 %v1941_v24  ;;  %v2758_v24 = vpop.permute.xlu0 %1185 }
 0x162   :  { %1328 = vmatmul.mubr.f32.vlgmr.msra.gmra.mrb[0].mxu1 %v1007_v25  ;;  %v2760_v25 = vpop.permute.xlu1 %1190 }
 0x163   :  { %1332 = vmatprep.mubr.f32.mxu1 %v1010_v26  ;;  %v1106_v26 = vpop.permute.xlu0 %1105 }
 0x166   :  { %1333 = vmatmul.mubr.f32.gmra.mrb[2].mxu1 %v1009_v27  ;;  %v1111_v27 = vpop.permute.xlu1 %1110 }
 0x167   :  { %1337 = vmatprep.mubr.f32.mxu1 %v1012_v5  ;;  %v2762_v5 = vpop.permute.xlu0 %1195 }
 0x16a   :  { %1338 = vmatmul.mubr.f32.gmra.mrb[4].mxu1 %v1011_v28  ;;  %v2764_v28 = vpop.permute.xlu1 %1200 }
 0x16b   :  { %1342 = vmatprep.mubr.f32.mxu1 %v1014_v29  ;;  %v1116_v29 = vpop.permute.xlu0 %1115 }
 0x16e   :  { %1343 = vmatmul.mubr.f32.gmra.mrb[6].mxu1 %v1013_v30  ;;  %v1121_v30 = vpop.permute.xlu1 %1120 }
 0x16f   :  { %1347 = vmatprep.mubr.f32.mxu1 %v1016_v31  ;;  %v2766_v31 = vpop.permute.xlu0 %1205 }
 0x172   :  { %1348 = vmatmul.mubr.f32.gmra.mrb[8].mxu1 %v1015_v32  ;;  %v2768_v32 = vpop.permute.xlu1 %1210 }
 0x173   :  { %1352 = vmatprep.mubr.f32.mxu1 %v1018_v33  ;;  %v1527_v33 = vlaneseq }
 0x176   :  { %1353 = vmatmul.mubr.f32.gmra.mrb[10].mxu1 %v1017_v34  ;;  %v1126_v34 = vpop.permute.xlu0 %1125 }
 0x177   :  { %1357 = vmatprep.mubr.f32.mxu1 %v1020_v35  ;;  %v1131_v35 = vpop.permute.xlu1 %1130 }
 0x17a   :  { %1358 = vmatmul.mubr.f32.gmra.mrb[12].mxu1 %v1019_v36  ;;  %v2770_v36 = vshrl.u32 %v1527_v33, 7 }
 0x17b   :  { %1362 = vmatprep.mubr.f32.mxu1 %v1022_v37 }
 0x17e   :  { %1363 = vmatmul.mubr.f32.gmra.mrb[14].mxu1 %v1021_v38  ;;  %v2775_v38 = vld [vmem:[%s2860_s7] sm:$0x3]  ;;  %s2038_s7 = smov [#allocation3]  }
 0x17f   :  { %1367 = vmatprep.mubr.f32.mxu1 %v1024_v39  ;;  %s1620_s10 = sshll.u32 %s2038_s7, 4  ;;  %s1621_s10 = int_to_ptr.vmem [resolvable:$true] %s1620_s10 }
 0x180   :  { %s2012_s11 = scalar_lea.vmem %s1621_s10, 16  ;;  %s2016_s12 = scalar_lea.vmem %s1621_s10, 32 }
 0x181   :  { %p2013_p0 = scmp.ne.s32.totalorder %s1621_s10, %s2012_s11  ;;  %p2017_p1 = scmp.lt.s32.totalorder %s1621_s10, %s1621_s10 }
 0x182   :  { %1368 = vmatmul.mubr.f32.gmra.mrb[16].mxu1 %v1023_v40  ;;  %v1538_v40 = vsub.s32 1, %v2770_v36  ;;  %p2018_p2 = scmp.lt.s32.totalorder %s2016_s12, %s2012_s11 }
 0x183   :  { %1372 = vmatprep.mubr.f32.mxu1 %v1026_v41 }
 0x184   :  { %p2019_p3 = por %p2018_p2, %p2017_p1 }
 0x186   :  { %1373 = vmatmul.mubr.f32.gmra.mrb[18].mxu1 %v1025_v42  ;;  %v2778_v42 = vpop.permute.xlu0 %1215  ;;  %p2020_p4 = pnand %p2019_p3, %p2013_p0 }
 0x187   :  { %1377 = vmatprep.mubr.f32.mxu1 %v1028_v43 }
 0x18a   :  { %1378 = vmatmul.mubr.f32.gmra.mrb[20].mxu1 %v1027_v44  ;;  %v1539_v44 = vrot.slane %v2775_v38, %v1538_v40 }
 0x18b   :  { %1382 = vmatprep.mubr.f32.mxu1 %v1030_v45 }
 0x18c   :  { %1606 = vmatprep.mubr.f32.mxu0 %v1539_v44 }
 0x18e   :  { %1383 = vmatmul.mubr.f32.gmra.mrb[22].mxu1 %v1029_v46 }
 0x18f   :  { %1387 = vmatprep.mubr.f32.mxu1 %v1032_v47  ;;  %v2781_v47 = vpop.permute.xlu1 %1220 }
 0x192   :  { %1388 = vmatmul.mubr.f32.gmra.mrb[24].mxu1 %v1031_v48 }
 0x193   :  { %1392 = vmatprep.mubr.f32.mxu1 %v1034_v49 }
 0x196   :  { %1393 = vmatmul.mubr.f32.gmra.mrb[26].mxu1 %v1033_v50 }
 0x197   :  { %1397 = vmatprep.mubr.f32.mxu1 %v1036_v51 }
 0x19a   :  { %1398 = vmatmul.mubr.f32.gmra.mrb[28].mxu1 %v1035_v52 }
 0x19b   :  { %1402 = vmatprep.mubr.f32.mxu1 %v1038_v53  ;;  %v1136_v53 = vpop.permute.xlu0 %1135 }
 0x19e   :  { %1403 = vmatmul.mubr.f32.gmra.mrb[30].mxu1 %v1037_v54 }
 0x19f   :  { %1407 = vmatprep.mubr.f32.mxu1 %v1040_v55  ;;  %v1141_v55 = vpop.permute.xlu1 %1140 }
 0x1a2   :  { %1408 = vmatmul.mubr.f32.gmra.mrb[32].mxu1 %v1039_v56 }
 0x1a3   :  { %1412 = vmatprep.mubr.f32.mxu1 %v1042_v57 }
 0x1a6   :  { %1413 = vmatmul.mubr.f32.gmra.mrb[34].mxu1 %v1041_v58 }
 0x1a7   :  { %1417 = vmatprep.mubr.f32.mxu1 %v1044_v59 }
 0x1aa   :  { %1418 = vmatmul.mubr.f32.gmra.mrb[36].mxu1 %v1043_v60 }
 0x1ab   :  { %1422 = vmatprep.mubr.f32.mxu1 %v1046_v61  ;;  %v2785_v61 = vpop.permute.xlu0 %1225 }
 0x1ae   :  { %1423 = vmatmul.mubr.f32.gmra.mrb[38].mxu1 %v1045_v62 }
 0x1af   :  { %1427 = vmatprep.mubr.f32.mxu1 %v1048_v63 }
 0x1b2   :  { %1428 = vmatmul.mubr.f32.gmra.mrb[40].mxu1 %v1047_v0 }
 0x1b3   :  { %1432 = vmatprep.mubr.f32.mxu1 %v1050_v1  ;;  %v2789_v1 = vpop.permute.xlu1 %1230 }
 0x1b6   :  { %1433 = vmatmul.mubr.f32.gmra.mrb[42].mxu1 %v1049_v2 }
 0x1b7   :  { %1437 = vmatprep.mubr.f32.mxu1 %v1052_v3 }
 0x1ba   :  { %1438 = vmatmul.mubr.f32.gmra.mrb[44].mxu1 %v1051_v4 }
 0x1bb   :  { %1442 = vmatprep.mubr.f32.mxu1 %v1054_v6 }
 0x1be   :  { %1443 = vmatmul.mubr.f32.gmra.mrb[46].mxu1 %v1053_v7  ;;  %v1146_v7 = vpop.permute.xlu0 %1145 }
 0x1bf   :  { %1447 = vmatprep.mubr.f32.mxu1 %v1056_v8 }
 0x1c2   :  { %1448 = vmatmul.mubr.f32.gmra.mrb[48].mxu1 %v1055_v9 }
 0x1c3   :  { %1452 = vmatprep.mubr.f32.mxu1 %v1058_v10  ;;  %v1151_v10 = vpop.permute.xlu1 %1150 }
 0x1c6   :  { %1453 = vmatmul.mubr.f32.gmra.mrb[50].mxu1 %v1057_v11 }
 0x1c7   :  { %1457 = vmatprep.mubr.f32.mxu1 %v1060_v12 }
 0x1ca   :  { %1458 = vmatmul.mubr.f32.gmra.mrb[52].mxu1 %v1059_v13 }
 0x1cb   :  { %1462 = vmatprep.mubr.f32.mxu1 %v1062_v14 }
 0x1ce   :  { %1463 = vmatmul.mubr.f32.gmra.mrb[54].mxu1 %v1061_v15  ;;  %v2793_v15 = vpop.permute.xlu0 %1235 }
 0x1cf   :  { %1467 = vmatprep.mubr.f32.mxu1 %v1064_v16 }
 0x1d2   :  { %1468 = vmatmul.mubr.f32.gmra.mrb[56].mxu1 %v1063_v17 }
 0x1d3   :  { %1472 = vmatprep.mubr.f32.mxu1 %v1066_v18 }
 0x1d6   :  { %1473 = vmatmul.mubr.f32.gmra.mrb[58].mxu1 %v1065_v19  ;;  %v2795_v19 = vpop.permute.xlu1 %1240 }
 0x1d7   :  { %1477 = vmatprep.mubr.f32.mxu1 %v1068_v20 }
 0x1da   :  { %1478 = vmatmul.mubr.f32.gmra.mrb[60].mxu1 %v1067_v21 }
 0x1db   :  { %1482 = vmatprep.mubr.f32.mxu1 %v1070_v22 }
 0x1de   :  { %1483 = vmatmul.mubr.f32.gmra.mrb[62].mxu1 %v1069_v23 }
 0x235   :  { %v1329_v37 = vpop.f32.mrb[0].mxu1 }
 0x236   :  { %v1331_v39 = vpop.f32.mrb[1].mxu1  ;;  %v1330_v41 = vadd.f32 %v1329_v37, %v1106_v26 }
 0x238   :  { %v1488_v48 = vmax.f32 %v1330_v41, 0.0 }
 0x239   :  { %v1334_v43 = vpop.f32.mrb[2].mxu1 }
 0x23a   :  { %v1335_v45 = vadd.f32 %v1334_v43, %v1111_v27  ;;  %v1336_v46 = vpop.f32.mrb[3].mxu1  ;;  %v1156_v27 = vpop.permute.xlu0 %1155 }
 0x23c   :  { %v1489_v49 = vmax.f32 %v1335_v45, 0.0 }
 0x23d   :  { %v1339_v50 = vpop.f32.mrb[4].mxu1 }
 0x23e   :  { %v2783_v51 = vpack.c.bf16 %v1489_v49, %v1488_v48  ;;  %v1341_v52 = vpop.f32.mrb[5].mxu1  ;;  %v1340_v54 = vadd.f32 %v1339_v50, %v1116_v29  ;;  %v2799_v40 = vpop.permute.xlu0 %1245 }
 0x240   :  { %v1490_v59 = vmax.f32 %v1340_v54, 0.0 }
 0x241   :  { %v1344_v56 = vpop.f32.mrb[6].mxu1 }
 0x242   :  { %v1345_v57 = vadd.f32 %v1344_v56, %v1121_v30  ;;  %v1346_v58 = vpop.f32.mrb[7].mxu1  ;;  %v1161_v30 = vpop.permute.xlu1 %1160 }
 0x243   :  { %v1166_v52 = vpop.permute.xlu0 %1165 }
 0x244   :  { %v1491_v60 = vmax.f32 %v1345_v57, 0.0 }
 0x245   :  { %v1349_v62 = vpop.f32.mrb[8].mxu1 }
 0x246   :  { %v2787_v63 = vpack.c.bf16 %v1491_v60, %v1490_v59  ;;  %v1351_v0 = vpop.f32.mrb[9].mxu1  ;;  %v1350_v2 = vadd.f32 %v1349_v62, %v1126_v34  ;;  %v2803_v45 = vpop.permute.xlu1 %1250 }
 0x247   :  { %v2807_v60 = vpop.permute.xlu0 %1255 }
 0x248   :  { %v1492_v8 = vmax.f32 %v1350_v2, 0.0 }
 0x249   :  { %v1354_v3 = vpop.f32.mrb[10].mxu1 }
 0x24a   :  { %v1355_v4 = vadd.f32 %v1354_v3, %v1131_v35  ;;  %v1356_v6 = vpop.f32.mrb[11].mxu1 }
 0x24c   :  { %v1493_v9 = vmax.f32 %v1355_v4, 0.0 }
 0x24d   :  { %v1359_v11 = vpop.f32.mrb[12].mxu1 }
 0x24e   :  { %v2791_v12 = vpack.c.bf16 %v1493_v9, %v1492_v8  ;;  %v1361_v13 = vpop.f32.mrb[13].mxu1  ;;  %v1360_v14 = vadd.f32 %v1359_v11, %v1136_v53 }
 0x250   :  { %v1494_v20 = vmax.f32 %v1360_v14, 0.0 }
 0x251   :  { %v1364_v16 = vpop.f32.mrb[14].mxu1 }
 0x252   :  { %v1365_v17 = vadd.f32 %v1364_v16, %v1141_v55  ;;  %v1366_v18 = vpop.f32.mrb[15].mxu1  ;;  %v1171_v55 = vpop.permute.xlu1 %1170 }
 0x254   :  { %v1495_v21 = vmax.f32 %v1365_v17, 0.0 }
 0x255   :  { %v1369_v22 = vpop.f32.mrb[16].mxu1 }
 0x256   :  { %v2797_v23 = vpack.c.bf16 %v1495_v21, %v1494_v20  ;;  %v1371_v26 = vpop.f32.mrb[17].mxu1  ;;  %v1370_v29 = vadd.f32 %v1369_v22, %v1146_v7  ;;  %v2809_v3 = vpop.permute.xlu1 %1260 }
 0x258   :  { %v1496_v37 = vmax.f32 %v1370_v29, 0.0 }
 0x259   :  { %v1374_v33 = vpop.f32.mrb[18].mxu1 }
 0x25a   :  { %v1375_v34 = vadd.f32 %v1374_v33, %v1151_v10  ;;  %v1376_v35 = vpop.f32.mrb[19].mxu1  ;;  %v1176_v10 = vpop.permute.xlu0 %1175 }
 0x25b   :  { %v1181_v13 = vpop.permute.xlu1 %1180 }
 0x25c   :  { %v1497_v39 = vmax.f32 %v1375_v34, 0.0 }
 0x25d   :  { %v1379_v41 = vpop.f32.mrb[20].mxu1 }
 0x25e   :  { %v2801_v43 = vpack.c.bf16 %v1497_v39, %v1496_v37  ;;  %v1381_v44 = vpop.f32.mrb[21].mxu1  ;;  %v1380_v46 = vadd.f32 %v1379_v41, %v1156_v27 }
 0x260   :  { %v1498_v53 = vmax.f32 %v1380_v46, 0.0 }
 0x261   :  { %v1384_v48 = vpop.f32.mrb[22].mxu1 }
 0x262   :  { %v1385_v49 = vadd.f32 %v1384_v48, %v1161_v30  ;;  %v1386_v50 = vpop.f32.mrb[23].mxu1 }
 0x264   :  { %v1499_v54 = vmax.f32 %v1385_v49, 0.0 }
 0x265   :  { %v1389_v56 = vpop.f32.mrb[24].mxu1 }
 0x266   :  { %v2805_v57 = vpack.c.bf16 %v1499_v54, %v1498_v53  ;;  %v1391_v58 = vpop.f32.mrb[25].mxu1  ;;  %v1390_v59 = vadd.f32 %v1389_v56, %v1166_v52 }
 0x268   :  { %v1500_v4 = vmax.f32 %v1390_v59, 0.0 }
 0x269   :  { %v1394_v62 = vpop.f32.mrb[26].mxu1 }
 0x26a   :  { %v1395_v0 = vadd.f32 %v1394_v62, %v1171_v55  ;;  %v1396_v2 = vpop.f32.mrb[27].mxu1 }
 0x26c   :  { %v1501_v6 = vmax.f32 %v1395_v0, 0.0 }
 0x26d   :  { %v1399_v7 = vpop.f32.mrb[28].mxu1 }
 0x26e   :  { %v2811_v8 = vpack.c.bf16 %v1501_v6, %v1500_v4  ;;  %v1401_v9 = vpop.f32.mrb[29].mxu1  ;;  %v1400_v11 = vadd.f32 %v1399_v7, %v1176_v10 }
 0x270   :  { %v1502_v18 = vmax.f32 %v1400_v11, 0.0 }
 0x271   :  { %v1404_v14 = vpop.f32.mrb[30].mxu1 }
 0x272   :  { %v1405_v16 = vadd.f32 %v1404_v14, %v1181_v13  ;;  %v1406_v17 = vpop.f32.mrb[31].mxu1 }
 0x274   :  { %v1503_v20 = vmax.f32 %v1405_v16, 0.0 }
 0x275   :  { %v1409_v21 = vpop.f32.mrb[32].mxu1 }
 0x276   :  { %v2813_v22 = vpack.c.bf16 %v1503_v20, %v1502_v18  ;;  %v1411_v26 = vpop.f32.mrb[33].mxu1  ;;  %v1410_v27 = vadd.f32 %v1409_v21, %v2758_v24 }
 0x278   :  { %v1504_v34 = vmax.f32 %v1410_v27, 0.0 }
 0x279   :  { %v1414_v29 = vpop.f32.mrb[34].mxu1 }
 0x27a   :  { %v1415_v30 = vadd.f32 %v1414_v29, %v2760_v25  ;;  %v1416_v33 = vpop.f32.mrb[35].mxu1 }
 0x27c   :  { %v1505_v35 = vmax.f32 %v1415_v30, 0.0 }
 0x27d   :  { %v1419_v37 = vpop.f32.mrb[36].mxu1 }
 0x27e   :  { %v1943_v39 = vpack.c.bf16 %v1505_v35, %v1504_v34  ;;  %v1421_v41 = vpop.f32.mrb[37].mxu1  ;;  %v1420_v44 = vadd.f32 %v1419_v37, %v2762_v5 }
 0x280   :  { %1944 = vmatprep.subr.bf16.mxu0 %v1943_v39  ;;  %v1506_v50 = vmax.f32 %v1420_v44, 0.0 }
 0x281   :  { %v1424_v46 = vpop.f32.mrb[38].mxu1  ;;  %1946 = vmatpush3.bf16.msra.mxu0 %v2783_v51 }
 0x282   :  { %v1425_v48 = vadd.f32 %v1424_v46, %v2764_v28  ;;  %v1426_v49 = vpop.f32.mrb[39].mxu1 }
 0x284   :  { %v1507_v24 = vmax.f32 %v1425_v48, 0.0 }
 0x285   :  { %v1429_v52 = vpop.f32.mrb[40].mxu1 }
 0x286   :  { %v1947_v53 = vpack.c.bf16 %v1507_v24, %v1506_v50  ;;  %v1431_v25 = vpop.f32.mrb[41].mxu1  ;;  %v1430_v54 = vadd.f32 %v1429_v52, %v2766_v31  ;;  %v1525_v24 = vpop.permute.xlu0 %1524 }
 0x288   :  { %1948 = vmatprep.subr.bf16.mxu0 %v1947_v53  ;;  %v1508_v58 = vmax.f32 %v1430_v54, 0.0 }
 0x289   :  { %v1434_v55 = vpop.f32.mrb[42].mxu1  ;;  %1950 = vmatpush3.bf16.msra.mxu0 %v2787_v63 }
 0x28a   :  { %v1435_v5 = vadd.f32 %v1434_v55, %v2768_v32  ;;  %v1436_v56 = vpop.f32.mrb[43].mxu1 }
 0x28c   :  { %v1509_v59 = vmax.f32 %v1435_v5, 0.0 }
 0x28d   :  { %v1439_v51 = vpop.f32.mrb[44].mxu1 }
 0x28e   :  { %v1951_v62 = vpack.c.bf16 %v1509_v59, %v1508_v58  ;;  %v1441_v28 = vpop.f32.mrb[45].mxu1  ;;  %v1440_v0 = vadd.f32 %v1439_v51, %v2778_v42 }
 0x290   :  { %1952 = vmatprep.subr.bf16.mxu0 %v1951_v62  ;;  %v1510_v6 = vmax.f32 %v1440_v0, 0.0 }
 0x291   :  { %v1444_v2 = vpop.f32.mrb[46].mxu1  ;;  %1954 = vmatpush3.bf16.msra.mxu0 %v2791_v12 }
 0x292   :  { %v1445_v31 = vadd.f32 %v1444_v2, %v2781_v47  ;;  %v1446_v4 = vpop.f32.mrb[47].mxu1 }
 0x294   :  { %v1511_v7 = vmax.f32 %v1445_v31, 0.0 }
 0x295   :  { %v1449_v63 = vpop.f32.mrb[48].mxu1 }
 0x296   :  { %v1955_v9 = vpack.c.bf16 %v1511_v7, %v1510_v6  ;;  %v1451_v32 = vpop.f32.mrb[49].mxu1  ;;  %v1450_v10 = vadd.f32 %v1449_v63, %v2785_v61 }
 0x298   :  { %1956 = vmatprep.subr.bf16.mxu0 %v1955_v9  ;;  %v1512_v14 = vmax.f32 %v1450_v10, 0.0 }
 0x299   :  { %v1454_v11 = vpop.f32.mrb[50].mxu1  ;;  %1958 = vmatpush3.bf16.msra.mxu0 %v2797_v23 }
 0x29a   :  { %v1455_v42 = vadd.f32 %v1454_v11, %v2789_v1  ;;  %v1456_v13 = vpop.f32.mrb[51].mxu1 }
 0x29c   :  { %v1513_v16 = vmax.f32 %v1455_v42, 0.0 }
 0x29d   :  { %v1459_v12 = vpop.f32.mrb[52].mxu1 }
 0x29e   :  { %v1959_v17 = vpack.c.bf16 %v1513_v16, %v1512_v14  ;;  %v1461_v47 = vpop.f32.mrb[53].mxu1  ;;  %v1460_v18 = vadd.f32 %v1459_v12, %v2793_v15 }
 0x2a0   :  { %1960 = vmatprep.subr.bf16.mxu0 %v1959_v17  ;;  %v1514_v26 = vmax.f32 %v1460_v18, 0.0 }
 0x2a1   :  { %v1464_v20 = vpop.f32.mrb[54].mxu1  ;;  %1962 = vmatpush3.bf16.msra.mxu0 %v2801_v43 }
 0x2a2   :  { %v1465_v61 = vadd.f32 %v1464_v20, %v2795_v19  ;;  %v1466_v21 = vpop.f32.mrb[55].mxu1 }
 0x2a4   :  { %v1515_v27 = vmax.f32 %v1465_v61, 0.0 }
 0x2a5   :  { %v1469_v23 = vpop.f32.mrb[56].mxu1 }
 0x2a6   :  { %v1963_v29 = vpack.c.bf16 %v1515_v27, %v1514_v26  ;;  %v1471_v1 = vpop.f32.mrb[57].mxu1  ;;  %v1470_v30 = vadd.f32 %v1469_v23, %v2799_v40 }
 0x2a8   :  { %1964 = vmatprep.subr.bf16.mxu0 %v1963_v29  ;;  %v1516_v35 = vmax.f32 %v1470_v30, 0.0 }
 0x2a9   :  { %v1474_v33 = vpop.f32.mrb[58].mxu1  ;;  %1966 = vmatpush3.bf16.msra.mxu0 %v2805_v57  ;;  %v1529_v57 = vsub.s32 0, %v2770_v36 }
 0x2aa   :  { %v1475_v15 = vadd.f32 %v1474_v33, %v2803_v45  ;;  %v1476_v34 = vpop.f32.mrb[59].mxu1 }
 0x2ab   :  { %v1535_v50 = vrot.slane %v2775_v38, %v1529_v57 }
 0x2ac   :  { %v1517_v37 = vmax.f32 %v1475_v15, 0.0 }
 0x2ad   :  { %v1479_v43 = vpop.f32.mrb[60].mxu1 }
 0x2ae   :  { %v1967_v39 = vpack.c.bf16 %v1517_v37, %v1516_v35  ;;  %v1481_v19 = vpop.f32.mrb[61].mxu1  ;;  %v1480_v41 = vadd.f32 %v1479_v43, %v2807_v60 }
 0x2b0   :  { %1968 = vmatprep.subr.bf16.mxu0 %v1967_v39  ;;  %v1518_v48 = vmax.f32 %v1480_v41, 0.0 }
 0x2b1   :  { %v1484_v44 = vpop.f32.mrb[62].mxu1  ;;  %1970 = vmatpush3.bf16.msra.mxu0 %v2811_v8  ;;  %v1530_v8 = vrot.slane %v1525_v24, %v1529_v57 }
 0x2b2   :  { %v1485_v40 = vadd.f32 %v1484_v44, %v2809_v3  ;;  %v1486_v46 = vpop.f32.mrb[63].mxu1 }
 0x2b4   :  { %v1519_v49 = vmax.f32 %v1485_v40, 0.0 }
 0x2b6   :  { %v1971_v45 = vpack.c.bf16 %v1519_v49, %v1518_v48 }
 0x2b8   :  { %1972 = vmatprep.subr.bf16.mxu0 %v1971_v45 }
 0x2b9   :  { %1974 = vmatpush3.bf16.msra.mxu0 %v2813_v22 }
 0x2bc   :  { %1607 = vmatmul.mubr.f32.vlgmr.msra.gmra.mrb[32].mxu0 %v1535_v50 }
 0x38f   :  { %v1792_v60 = vpop.f32.mrb[32].mxu0 }
 0x390   :  { %v1793_v52 = vpop.f32.mrb[33].mxu0 }
 0x391   :  { %v1794_v53 = vadd.f32 %v1793_v52, %v1792_v60 }
 0x393   :  { %v1609_v3 = vadd.f32 %v1794_v53, %v1530_v8 }
 0x395   :  { %1613 = vst.msk [vmem:[#allocation3] sm:$0x1] %vm1612_vm2, %v1609_v3 }
 0x396   :  { %2023 = shalt.err (!%p2020_p4)
}
 0x397   :  { %s2024_s15 = scalar_lea.hbm %s2862_s9, 16 }
 0x398   :  { %p2025_p5 = scmp.ne.s32.totalorder %s2862_s9, %s2024_s15  ;;  %p2028_p6 = scmp.lt.u32.totalorder %s2024_s15, %s2862_s9 }
 0x39a   :  { %p2030_p7 = pnand %p2028_p6, %p2025_p5 }
 0x39c   :  { %2033 = shalt.err (!%p2030_p7)
}
 0x39d   :  { %1623 = dma.vmem_to_hbm [thread:$0]  %s1621_s10, 16, %s2862_s9, [#allocation4]  }
 0x39e   :  { %2034 = dma.done.wait [#allocation4], 16  }
 0x39f   :  { %2035 = vsyncadd [#allocation4], 4294967280 }
 0x3a0   :  { %1627 = vsyncpa [#allocation4], 1 }

</bundles_post_ra>
